<compile_context>
chip_gen: v7x
topology: tpu7x:2x2x1
jax: 0.10.0
libtpu: 0.0.40
codegen_flags: <defaults>
</compile_context>

<pallas_src>
import numpy as np
import jax
import jax.numpy as jnp
from jax.experimental import pallas as pl
from jax.experimental.pallas import tpu as pltpu

HEADS = 2            # GATConv(heads=2, concat=False)
NEG_SLOPE = 0.2      # GAT leaky_relu slope
MASK_NEG = -1e30     # f32 softmax mask sentinel (softmax logits always f32)


def _round_up(a, b):
    return (a + b - 1) // b * b


def _choose_tile(n, num_rel):
    """dst-row tile: multiple of 32 (safe for f32 (8,128) and bf16 (16,128) tiling), <= 256
    (MXU-friendly on v6e/v7x), shrunk so the double-buffered [R, TN, Np] bf16 relation
    adjacency block stays inside a v7x-safe VMEM budget."""
    tn = min(256, _round_up(n, 32))
    while tn > 32 and 4 * num_rel * tn * _round_up(n, tn) > (12 << 20):
        tn //= 2
    return tn


def _compiler_params(bytes_est):
    # explicit scoped-VMEM limit (defaults are 16/32 MiB); cap below v7x's 64 MiB physical
    limit = int(min(max(2 * bytes_est + (8 << 20), 32 << 20), 48 << 20))
    return pltpu.CompilerParams(
        dimension_semantics=("parallel",),
        vmem_limit_bytes=limit,
    )


# --------------------------- kernel 1: SAGE + GAT projection ---------------------------
def _sage_gatproj_kernel(A_ref, x_ref, ws_ref, bs_ref, wg_ref, att_ref,
                         x1_ref, xh_ref, al_ref):
    f32 = jnp.float32
    tn = x1_ref.shape[0]
    off = pl.multiple_of(pl.program_id(0) * tn, tn)

    A = A_ref[...]                                                  # [TN, Np] bf16 edge counts
    # counts are small integers -> exact in bf16; widen after the reduce
    deg = jnp.maximum(jnp.sum(A, axis=1, keepdims=True).astype(f32), 1.0)
    x_all = x_ref[...]                                              # [Np, Fin] f32
    agg = jnp.dot(A, x_all.astype(jnp.bfloat16), preferred_element_type=f32)   # [TN, Fin]
    agg = agg * pl.reciprocal(deg, approx=True)                     # mean aggregation
    x_dst = x_ref[pl.ds(off, tn), :]                                # root features of this dst tile

    # fused SAGE matmul: [agg | x_dst] @ [w_l ; w_r]  (doubles K fill of the MXU)
    x1 = jnp.dot(jnp.concatenate([agg, x_dst], axis=1), ws_ref[...],
                 preferred_element_type=f32) + bs_ref[...]
    x1 = jnp.maximum(x1, 0.0)
    x1_ref[...] = x1

    # GAT projection fused into the same pass over x1
    xh = jnp.dot(x1, wg_ref[...], preferred_element_type=f32)       # [TN, heads*hid] f32
    xh_ref[...] = xh.astype(xh_ref.dtype)                           # bf16 value matrix for p @ xh
    al_ref[...] = jnp.dot(xh, att_ref[...], preferred_element_type=f32)  # [TN, 2*heads] (src|dst)


# --------------------------- kernel 2: GAT attention ---------------------------
def _gat_attention_kernel(Asl_ref, adst_ref, asrcT_ref, xh_ref, bg_ref, x2_ref):
    f32 = jnp.float32
    tn, hid = x2_ref.shape
    Asl = Asl_ref[...].astype(f32)                 # [TN, Np] counts with self loops
    mask = Asl > 0.0
    adst = adst_ref[...]                           # [TN, heads]  (column form, this dst tile)
    asrcT = asrcT_ref[...]                         # [heads, Np]  (row form, all src nodes)
    xh_all = xh_ref[...]                           # [Np, heads*hid] bf16

    # TODO(synk): for very large graphs switch to a flash-style online softmax over src tiles
    # so e/p stay [TN, TN_src] instead of [TN, Np].
    acc = jnp.zeros((tn, hid), f32)
    for h in range(HEADS):
        e = adst[:, h:h + 1] + asrcT[h:h + 1, :]                    # e[i,j] = a_dst(i) + a_src(j)
        e = jnp.where(e > 0.0, e, NEG_SLOPE * e)                    # leaky_relu
        e = jnp.where(mask, e, MASK_NEG)
        e = e - jnp.max(e, axis=1, keepdims=True)
        w = jnp.exp(e) * Asl                                        # edge-multiplicity-aware softmax
        inv = pl.reciprocal(jnp.sum(w, axis=1, keepdims=True), approx=True)
        p = (w * inv).astype(jnp.bfloat16)
        acc = acc + jnp.dot(p, xh_all[:, h * hid:(h + 1) * hid],
                            preferred_element_type=f32)
    x2_ref[...] = jnp.maximum(acc * (1.0 / HEADS) + bg_ref[...], 0.0)


# --------------------------- kernel 3: RGCN + output assembly ---------------------------
def _rgcn_concat_kernel(Arel_ref, x1_ref, x2_ref, wrel_ref, wroot_ref, br_ref, out_ref):
    f32 = jnp.float32
    tn, hid = x1_ref.shape
    emb = wroot_ref.shape[1]
    num_rel = Arel_ref.shape[0]
    np_src = Arel_ref.shape[2]
    off = pl.multiple_of(pl.program_id(0) * tn, tn)

    # batched per-relation aggregation: one [R*TN, Np] @ [Np, hid] MXU call
    A = Arel_ref[...].reshape(num_rel * tn, np_src)                 # layout-preserving (TN % 32 == 0)
    deg = jnp.maximum(jnp.sum(A, axis=1, keepdims=True).astype(f32), 1.0)
    agg = jnp.dot(A, x2_ref[...].astype(jnp.bfloat16), preferred_element_type=f32)
    agg = agg * pl.reciprocal(deg, approx=True)                     # [R*TN, hid]

    x2_dst = x2_ref[pl.ds(off, tn), :]
    out3 = jnp.dot(x2_dst, wroot_ref[...], preferred_element_type=f32) + br_ref[...]
    for r in range(num_rel):
        out3 = out3 + jnp.dot(agg[r * tn:(r + 1) * tn, :], wrel_ref[r],
                              preferred_element_type=f32)

    # lane-dense padded output tile, written with direct slice stores (torch.cat dim=1)
    out_ref[:, :hid] = x1_ref[...]
    out_ref[:, hid:2 * hid] = x2_dst
    out_ref[:, 2 * hid:2 * hid + emb] = out3
    out_ref[:, 2 * hid + emb:] = jnp.zeros((tn, out_ref.shape[1] - 2 * hid - emb), f32)


# --------------------------- wrapper ---------------------------
def classforge_ensemble_gnn(x, edge_index, edge_type, params, num_nodes, num_relations):
    f32, bf16 = jnp.float32, jnp.bfloat16
    N, R = num_nodes, num_relations
    fin = x.shape[1]
    hid = params['w_sage_l'].shape[1]
    emb = params['w_root'].shape[1]

    TN = _choose_tile(N, R)
    Np = _round_up(N, TN)
    n_tiles = Np // TN
    out_w = 2 * hid + emb
    out_p = _round_up(out_w, 128)

    # TODO(synk): dense [R, Np, Np] adjacency is O(R*N^2); for large sparse graphs use
    # scalar-prefetched per-dst-tile edge lists / block-sparse tiles instead.
    src, dst = edge_index[0], edge_index[1]
    A = jnp.zeros((Np, Np), f32).at[dst, src].add(1.0)              # [dst, src] edge counts
    eye = jnp.eye(Np, dtype=f32)
    A_sl = (A * (1.0 - eye) + eye).astype(bf16)                     # GAT: remove + add self loops
    Arel = jnp.zeros((R, Np, Np), f32).at[edge_type, dst, src].add(1.0).astype(bf16)
    A = A.astype(bf16)
    xp = jnp.zeros((Np, fin), f32).at[:N].set(x.astype(f32))

    # packed weights (built once, outside the kernels)
    ws_stack = jnp.concatenate([params['w_sage_l'], params['w_sage_r']], axis=0)   # [2*fin, hid]
    eye_h = jnp.eye(HEADS, dtype=f32)
    src_blk = jnp.einsum('hk,hg->hkg', params['att_src'], eye_h).reshape(HEADS * hid, HEADS)
    dst_blk = jnp.einsum('kh,hg->hkg', params['att_dst'], eye_h).reshape(HEADS * hid, HEADS)
    att_blk = jnp.concatenate([src_blk, dst_blk], axis=1)                          # [heads*hid, 2*heads]

    full = lambda i: (0, 0)
    row = lambda i: (i, 0)

    # ---- K1: SAGE (+ReLU) and GAT projection -------------------------------------------
    b1 = TN * Np * 2 + Np * fin * 4 + TN * (hid * 4 + HEADS * hid * 2 + 2 * HEADS * 4)
    x1, xh, alpha = pl.pallas_call(
        _sage_gatproj_kernel,
        out_shape=(jax.ShapeDtypeStruct((Np, hid), f32),
                   jax.ShapeDtypeStruct((Np, HEADS * hid), bf16),
                   jax.ShapeDtypeStruct((Np, 2 * HEADS), f32)),
        grid=(n_tiles,),
        in_specs=[pl.BlockSpec((TN, Np), row),                  # A tile
                  pl.BlockSpec((Np, fin), full),                # x (resident)
                  pl.BlockSpec((2 * fin, hid), full),
                  pl.BlockSpec((1, hid), full),
                  pl.BlockSpec((hid, HEADS * hid), full),
                  pl.BlockSpec((HEADS * hid, 2 * HEADS), full)],
        out_specs=(pl.BlockSpec((TN, hid), row),
                   pl.BlockSpec((TN, HEADS * hid), row),
                   pl.BlockSpec((TN, 2 * HEADS), row)),
        compiler_params=_compiler_params(b1),
    )(A, xp, ws_stack, params['b_sage'], params['w_gat'], att_blk)

    # tiny layout plumbing (wrapper, not per-tile): attention scalars in row / column form
    asrc_row = jnp.transpose(alpha[:, :HEADS])        # [heads, Np]
    adst_col = alpha[:, HEADS:]                       # [Np, heads]

    # ---- K2: GAT attention (+ReLU) ------------------------------------------------------
    b2 = (TN * Np * 2 + Np * (HEADS * hid * 2 + HEADS * 4) + HEADS * Np * 4
          + TN * hid * 4 + 3 * TN * Np * 4)
    x2 = pl.pallas_call(
        _gat_attention_kernel,
        out_shape=jax.ShapeDtypeStruct((Np, hid), f32),
        grid=(n_tiles,),
        in_specs=[pl.BlockSpec((TN, Np), row),                  # Asl tile
                  pl.BlockSpec((TN, HEADS), row),               # a_dst (this tile)
                  pl.BlockSpec((HEADS, Np), full),              # a_src rows (resident)
                  pl.BlockSpec((Np, HEADS * hid), full),        # xh values (resident)
                  pl.BlockSpec((1, hid), full)],
        out_specs=pl.BlockSpec((TN, hid), row),
        compiler_params=_compiler_params(b2),
    )(A_sl, adst_col, asrc_row, xh, params['b_gat'])

    # ---- K3: RGCN + assemble [x1 | x2 | x3] ---------------------------------------------
    b3 = R * TN * Np * 2 + Np * hid * 4 + TN * hid * 4 + TN * out_p * 4
    out = pl.pallas_call(
        _rgcn_concat_kernel,
        out_shape=jax.ShapeDtypeStruct((Np, out_p), f32),
        grid=(n_tiles,),
        in_specs=[pl.BlockSpec((R, TN, Np), lambda i: (0, i, 0)),   # relation adjacency tile
                  pl.BlockSpec((TN, hid), row),                     # x1 (this tile)
                  pl.BlockSpec((Np, hid), full),                    # x2 (resident)
                  pl.BlockSpec((R, hid, emb), lambda i: (0, 0, 0)),
                  pl.BlockSpec((hid, emb), full),
                  pl.BlockSpec((1, emb), full)],
        out_specs=pl.BlockSpec((TN, out_p), row),
        compiler_params=_compiler_params(b3),
    )(Arel, x1, x2, params['w_rel'], params['w_root'], params['b_rgcn'])

    return out[:N, :out_w]


# --------------------------- params / reference / test ---------------------------
def init_params(key, in_channels, hidden, embedding_size, num_relations, heads=HEADS):
    ks = jax.random.split(key, 10)

    def glorot(k, shape):
        fan_in, fan_out = shape[-2], shape[-1]
        s = (6.0 / (fan_in + fan_out)) ** 0.5
        return jax.random.uniform(k, shape, jnp.float32, -s, s)

    return {
        'w_sage_l': glorot(ks[0], (in_channels, hidden)),
        'w_sage_r': glorot(ks[1], (in_channels, hidden)),
        'b_sage':   0.1 * jax.random.normal(ks[2], (1, hidden), jnp.float32),
        'w_gat':    glorot(ks[3], (hidden, heads * hidden)),
        'att_src':  glorot(ks[4], (heads, hidden)),
        'att_dst':  glorot(ks[5], (hidden, heads)),
        'b_gat':    0.1 * jax.random.normal(ks[6], (1, hidden), jnp.float32),
        'w_rel':    glorot(ks[7], (num_relations, hidden, embedding_size)),
        'w_root':   glorot(ks[8], (hidden, embedding_size)),
        'b_rgcn':   0.1 * jax.random.normal(ks[9], (1, embedding_size), jnp.float32),
    }


def reference_forward(x, edge_index, edge_type, p, num_nodes, num_relations):
    """Plain-JAX f32 reference with identical math for correctness checking."""
    N = num_nodes
    src, dst = edge_index[0], edge_index[1]
    A = jnp.zeros((N, N), jnp.float32).at[dst, src].add(1.0)
    eye = jnp.eye(N, dtype=jnp.float32)
    Asl = A * (1.0 - eye) + eye
    Arel = jnp.zeros((num_relations, N, N), jnp.float32).at[edge_type, dst, src].add(1.0)

    deg = jnp.maximum(A.sum(1, keepdims=True), 1.0)
    x1 = jax.nn.relu(((A @ x) / deg) @ p['w_sage_l'] + p['b_sage'] + x @ p['w_sage_r'])

    xh = x1 @ p['w_gat']
    hid = x1.shape[1]
    acc = jnp.zeros((N, hid), jnp.float32)
    for h in range(HEADS):
        xh_h = xh[:, h * hid:(h + 1) * hid]
        d = xh_h @ p['att_dst'][:, h:h + 1]
        s = (xh_h @ p['att_src'][h:h + 1, :].T).T
        e = d + s
        e = jnp.where(e > 0, e, NEG_SLOPE * e)
        e = jnp.where(Asl > 0, e, MASK_NEG)
        e = e - e.max(1, keepdims=True)
        pm = jnp.exp(e) * Asl
        pm = pm / pm.sum(1, keepdims=True)
        acc = acc + pm @ xh_h
    x2 = jax.nn.relu(acc / HEADS + p['b_gat'])

    out3 = x2 @ p['w_root'] + p['b_rgcn']
    for r in range(num_relations):
        Ar = Arel[r]
        dr = jnp.maximum(Ar.sum(1, keepdims=True), 1.0)
        out3 = out3 + ((Ar @ x2) / dr) @ p['w_rel'][r]
    return jnp.concatenate([x1, x2, out3], axis=1)


if __name__ == "__main__":
    N, IN_CH, HID, EMB, NUM_REL, E = 32, 16, 32, 16, 3, 96

    key = jax.random.PRNGKey(0)
    kx, ke, kt, kp = jax.random.split(key, 4)

    x = jax.random.normal(kx, (N, IN_CH), jnp.float32)

    # unique directed edges, no self loops
    flat = jax.random.choice(ke, N * (N - 1), shape=(E,), replace=False)
    src = flat // (N - 1)
    rem = flat % (N - 1)
    dst = rem + (rem >= src).astype(rem.dtype)
    edge_index = jnp.stack([src, dst]).astype(jnp.int32)            # [2, E]
    edge_type = jax.random.randint(kt, (E,), 0, NUM_REL, jnp.int32)

    params = init_params(kp, IN_CH, HID, EMB, NUM_REL)

    out = classforge_ensemble_gnn(x, edge_index, edge_type, params, N, NUM_REL)
    out = jax.block_until_ready(out)

    ref = reference_forward(x, edge_index, edge_type, params, N, NUM_REL)
    assert out.shape == (N, 2 * HID + EMB)
    # kernel uses bf16 adjacency / value operands + approx reciprocal; reference is pure f32
    err = float(np.max(np.abs(np.asarray(out) - np.asarray(ref))))
    assert np.allclose(np.asarray(out), np.asarray(ref), atol=5e-2, rtol=5e-2), err

    print("KERNEL_OK")
</pallas_src>

<mosaic_0001>
module attributes {stable_mosaic.version = 11 : i64} {
  func.func @_sage_gatproj_kernel(%arg0: i32, %arg1: memref<32x32xbf16, #tpu.memory_space<vmem>>, %arg2: memref<32x16xf32, #tpu.memory_space<vmem>>, %arg3: memref<32x32xf32, #tpu.memory_space<vmem>>, %arg4: memref<1x32xf32, #tpu.memory_space<vmem>>, %arg5: memref<32x64xf32, #tpu.memory_space<vmem>>, %arg6: memref<64x4xf32, #tpu.memory_space<vmem>>, %arg7: memref<32x32xf32, #tpu.memory_space<vmem>>, %arg8: memref<32x64xbf16, #tpu.memory_space<vmem>>, %arg9: memref<32x4xf32, #tpu.memory_space<vmem>>) attributes {dimension_semantics = [#tpu.dimension_semantics<parallel>], iteration_bounds = array<i64: 1>, scalar_prefetch = 0 : i64, scratch_operands = 0 : i64, tpu.core_type = #tpu.core_type<tc>, window_params = [{transform_indices = @transform_0, window_bounds = array<i64: 32, 32>}, {pipeline_mode = #tpu.pipeline_mode<synchronous>, transform_indices = @transform_1, window_bounds = array<i64: 32, 16>}, {pipeline_mode = #tpu.pipeline_mode<synchronous>, transform_indices = @transform_2, window_bounds = array<i64: 32, 32>}, {pipeline_mode = #tpu.pipeline_mode<synchronous>, transform_indices = @transform_3, window_bounds = array<i64: 1, 32>}, {pipeline_mode = #tpu.pipeline_mode<synchronous>, transform_indices = @transform_4, window_bounds = array<i64: 32, 64>}, {pipeline_mode = #tpu.pipeline_mode<synchronous>, transform_indices = @transform_5, window_bounds = array<i64: 64, 4>}, {transform_indices = @transform_6, window_bounds = array<i64: 32, 32>}, {transform_indices = @transform_7, window_bounds = array<i64: 32, 64>}, {transform_indices = @transform_8, window_bounds = array<i64: 32, 4>}]} {
    %c32_i32 = arith.constant 32 : i32
    %0 = arith.muli %arg0, %c32_i32 : i32
    %1 = tpu.assume_multiple %0, 32 : i32
    %c0 = arith.constant 0 : index
    %c0_0 = arith.constant 0 : index
    %2 = vector.load %arg1[%c0, %c0_0] : memref<32x32xbf16, #tpu.memory_space<vmem>>, vector<32x32xbf16>
    %3 = arith.extf %2 : vector<32x32xbf16> to vector<32x32xf32>
    %cst = arith.constant dense<0.000000e+00> : vector<32xf32>
    %4 = vector.multi_reduction <add>, %3, %cst [1] : vector<32x32xf32> to vector<32xf32>
    %5 = vector.shape_cast %4 : vector<32xf32> to vector<32x1xf32>
    %6 = arith.truncf %5 : vector<32x1xf32> to vector<32x1xbf16>
    %7 = arith.extf %6 : vector<32x1xbf16> to vector<32x1xf32>
    %cst_1 = arith.constant 1.000000e+00 : f32
    %8 = vector.broadcast %cst_1 : f32 to vector<32x1xf32>
    %9 = arith.maximumf %7, %8 : vector<32x1xf32>
    %c0_2 = arith.constant 0 : index
    %c0_3 = arith.constant 0 : index
    %10 = vector.load %arg2[%c0_2, %c0_3] : memref<32x16xf32, #tpu.memory_space<vmem>>, vector<32x16xf32>
    %11 = arith.truncf %10 : vector<32x16xf32> to vector<32x16xbf16>
    %cst_4 = arith.constant dense<0.000000e+00> : vector<32x16xf32>
    %12 = tpu.matmul %2, %11, %cst_4 {dimension_numbers = #tpu.dot_dimension_numbers<[1], [0], [0], [1], [0, 0, 1, 1], [], []>} : vector<32x32xbf16>, vector<32x16xbf16>, vector<32x16xf32> -> vector<32x16xf32>
    %13 = tpu.reciprocal %9 {approx = true} : vector<32x1xf32> -> vector<32x1xf32>
    %14 = vector.broadcast %13 : vector<32x1xf32> to vector<32x16xf32>
    %15 = arith.mulf %12, %14 : vector<32x16xf32>
    %16 = arith.index_cast %1 : i32 to index
    %c0_5 = arith.constant 0 : index
    %17 = vector.load %arg2[%16, %c0_5] : memref<32x16xf32, #tpu.memory_space<vmem>>, vector<32x16xf32>
    %18 = tpu.concatenate %15, %17 in 1 : vector<32x16xf32>, vector<32x16xf32> -> vector<32x32xf32>
    %c0_6 = arith.constant 0 : index
    %c0_7 = arith.constant 0 : index
    %19 = vector.load %arg3[%c0_6, %c0_7] : memref<32x32xf32, #tpu.memory_space<vmem>>, vector<32x32xf32>
    %cst_8 = arith.constant dense<0.000000e+00> : vector<32x32xf32>
    %20 = tpu.matmul %18, %19, %cst_8 {dimension_numbers = #tpu.dot_dimension_numbers<[1], [0], [0], [1], [0, 0, 1, 1], [], []>} : vector<32x32xf32>, vector<32x32xf32>, vector<32x32xf32> -> vector<32x32xf32>
    %c0_9 = arith.constant 0 : index
    %c0_10 = arith.constant 0 : index
    %21 = vector.load %arg4[%c0_9, %c0_10] : memref<1x32xf32, #tpu.memory_space<vmem>>, vector<1x32xf32>
    %22 = vector.broadcast %21 : vector<1x32xf32> to vector<32x32xf32>
    %23 = arith.addf %20, %22 : vector<32x32xf32>
    %cst_11 = arith.constant 0.000000e+00 : f32
    %24 = vector.broadcast %cst_11 : f32 to vector<32x32xf32>
    %25 = arith.maximumf %23, %24 : vector<32x32xf32>
    %c0_12 = arith.constant 0 : index
    %c0_13 = arith.constant 0 : index
    %26 = vector.load %arg7[%c0_12, %c0_13] : memref<32x32xf32, #tpu.memory_space<vmem>>, vector<32x32xf32>
    tpu.vector_store %arg7[%c0_12, %c0_13], %25 {strides = array<i32>} : memref<32x32xf32, #tpu.memory_space<vmem>>, vector<32x32xf32>,
    %c0_14 = arith.constant 0 : index
    %c0_15 = arith.constant 0 : index
    %27 = vector.load %arg5[%c0_14, %c0_15] : memref<32x64xf32, #tpu.memory_space<vmem>>, vector<32x64xf32>
    %cst_16 = arith.constant dense<0.000000e+00> : vector<32x64xf32>
    %28 = tpu.matmul %25, %27, %cst_16 {dimension_numbers = #tpu.dot_dimension_numbers<[1], [0], [0], [1], [0, 0, 1, 1], [], []>} : vector<32x32xf32>, vector<32x64xf32>, vector<32x64xf32> -> vector<32x64xf32>
    %29 = arith.truncf %28 : vector<32x64xf32> to vector<32x64xbf16>
    %c0_17 = arith.constant 0 : index
    %c0_18 = arith.constant 0 : index
    %30 = vector.load %arg8[%c0_17, %c0_18] : memref<32x64xbf16, #tpu.memory_space<vmem>>, vector<32x64xbf16>
    tpu.vector_store %arg8[%c0_17, %c0_18], %29 {strides = array<i32>} : memref<32x64xbf16, #tpu.memory_space<vmem>>, vector<32x64xbf16>,
    %c0_19 = arith.constant 0 : index
    %c0_20 = arith.constant 0 : index
    %31 = vector.load %arg6[%c0_19, %c0_20] : memref<64x4xf32, #tpu.memory_space<vmem>>, vector<64x4xf32>
    %cst_21 = arith.constant dense<0.000000e+00> : vector<32x4xf32>
    %32 = tpu.matmul %28, %31, %cst_21 {dimension_numbers = #tpu.dot_dimension_numbers<[1], [0], [0], [1], [0, 0, 1, 1], [], []>} : vector<32x64xf32>, vector<64x4xf32>, vector<32x4xf32> -> vector<32x4xf32>
    %c0_22 = arith.constant 0 : index
    %c0_23 = arith.constant 0 : index
    %33 = vector.load %arg9[%c0_22, %c0_23] : memref<32x4xf32, #tpu.memory_space<vmem>>, vector<32x4xf32>
    tpu.vector_store %arg9[%c0_22, %c0_23], %32 {strides = array<i32>} : memref<32x4xf32, #tpu.memory_space<vmem>>, vector<32x4xf32>,
    return
  }
  func.func @transform_0(%arg0: i32) -> (i32, i32) {
    %c0_i32 = arith.constant 0 : i32
    %c0_i32_0 = arith.constant 0 : i32
    return %arg0, %c0_i32 : i32, i32
  }
  func.func @transform_1(%arg0: i32) -> (i32, i32) {
    %c0_i32 = arith.constant 0 : i32
    %c0_i32_0 = arith.constant 0 : i32
    %c0_i32_1 = arith.constant 0 : i32
    return %c0_i32, %c0_i32_0 : i32, i32
  }
  func.func @transform_2(%arg0: i32) -> (i32, i32) {
    %c0_i32 = arith.constant 0 : i32
    %c0_i32_0 = arith.constant 0 : i32
    %c0_i32_1 = arith.constant 0 : i32
    return %c0_i32, %c0_i32_0 : i32, i32
  }
  func.func @transform_3(%arg0: i32) -> (i32, i32) {
    %c0_i32 = arith.constant 0 : i32
    %c0_i32_0 = arith.constant 0 : i32
    %c0_i32_1 = arith.constant 0 : i32
    return %c0_i32, %c0_i32_0 : i32, i32
  }
  func.func @transform_4(%arg0: i32) -> (i32, i32) {
    %c0_i32 = arith.constant 0 : i32
    %c0_i32_0 = arith.constant 0 : i32
    %c0_i32_1 = arith.constant 0 : i32
    return %c0_i32, %c0_i32_0 : i32, i32
  }
  func.func @transform_5(%arg0: i32) -> (i32, i32) {
    %c0_i32 = arith.constant 0 : i32
    %c0_i32_0 = arith.constant 0 : i32
    %c0_i32_1 = arith.constant 0 : i32
    return %c0_i32, %c0_i32_0 : i32, i32
  }
  func.func @transform_6(%arg0: i32) -> (i32, i32) {
    %c0_i32 = arith.constant 0 : i32
    %c0_i32_0 = arith.constant 0 : i32
    return %arg0, %c0_i32 : i32, i32
  }
  func.func @transform_7(%arg0: i32) -> (i32, i32) {
    %c0_i32 = arith.constant 0 : i32
    %c0_i32_0 = arith.constant 0 : i32
    return %arg0, %c0_i32 : i32, i32
  }
  func.func @transform_8(%arg0: i32) -> (i32, i32) {
    %c0_i32 = arith.constant 0 : i32
    %c0_i32_0 = arith.constant 0 : i32
    return %arg0, %c0_i32 : i32, i32
  }
}

</mosaic_0001>

<bundles_post_ra>
// kernel: tpu_custom_call.1
= control target key start
LH: loop header
LB: loop body
LE: loop exit
PB: predicated region body
PF: predicated region fallthrough
CT: control target
= control target key end

     0   :  { %14 = vsyncpa [#allocation3], 0  ;;  %vm38_vm0 = vcmask 261120   ;;  %s955_s0 = inlined_call_operand.vmem [shape: bf16[32,32], index: 0, kind: input, shape index: {}]   ;;  %s956_s1 = inlined_call_operand.vmem [shape: f32[32,16], index: 1, kind: input, shape index: {}]   ;;  %s957_s2 = inlined_call_operand.vmem [shape: f32[32,32], index: 2, kind: input, shape index: {}]   ;;  %s958_s3 = inlined_call_operand.vmem [shape: f32[1,32], index: 3, kind: input, shape index: {}]   ;;  %s959_s4 = inlined_call_operand.vmem [shape: f32[32,64], index: 4, kind: input, shape index: {}]   ;;  %s960_s5 = inlined_call_operand.vmem [shape: f32[64,4], index: 5, kind: input, shape index: {}]   ;;  %s961_s6 = inlined_call_operand.hbm [shape: f32[32,32], index: 6, kind: output, shape index: {0}]   ;;  %s962_s7 = inlined_call_operand.hbm [shape: bf16[32,64], index: 7, kind: output, shape index: {1}]   ;;  %s963_s8 = inlined_call_operand.vmem [shape: f32[32,4], index: 8, kind: output, shape index: {2}]  }
   0x1   :  { %v61_v0 = vld [vmem:[%s956_s1] sm:$0xff]  ;;  %v62_v1 = vld [vmem:[%s956_s1 + $0x8] sm:$0xff]  ;;  %v63_v2 = vld [vmem:[%s956_s1 + $0x10] sm:$0xff] }
   0x2   :  { %v65_v3 = vpack.c.bf16 %v62_v1, %v61_v0  ;;  %v64_v4 = vld [vmem:[%s956_s1 + $0x18] sm:$0xff]  ;;  %v30_v5 = vld [vmem:[%s955_s0] sm:$0xff]   ;;  %v32_v7 = vld [vmem:[%s955_s0 + $0x8] sm:$0xff]  }
   0x3   :  { %v66_v6 = vpack.c.bf16 %v64_v4, %v63_v2  ;;  %v34_v8 = vunpack.c.l.bf16 %v30_v5 }
   0x4   :  { %15 = vsyncpa [#allocation5], 0  ;;  %608 = vmatprep.subr.bf16.mxu0 %v65_v3  ;;  %v36_v9 = vunpack.c.l.bf16 %v32_v7  ;;  %v35_v10 = vunpack.c.h.bf16 %v30_v5  ;;  %v37_v11 = vunpack.c.h.bf16 %v32_v7  ;;  %612 = vmatprep.mubr.msk.bf16.mxu0 %vm38_vm0, %v30_v5  ;;  %s765_s0 = smov 16   ;;  %v166_v16 = vld [vmem:[%s957_s2] sm:$0xff]  ;;  %v167_v17 = vld [vmem:[%s957_s2 + $0x8] sm:$0xff]  ;;  %vm161_vm1 = vcmask 130048  }
   0x5   :  { %609 = vmatpush3.bf16.msra.mxu0 %v65_v3  ;;  %v39_v12 = vsel %vm38_vm0, %v34_v8, 0.0  ;;  %v666_v18 = vpack.c.bf16 %v167_v17, %v166_v16  ;;  %v168_v19 = vld [vmem:[%s957_s2 + $0x10] sm:$0xff]  ;;  %v169_v20 = vld [vmem:[%s957_s2 + $0x18] sm:$0xff]  ;;  %v282_v22 = vld [vmem:[%s959_s4] sm:$0xff]  ;;  %vm412_vm2 = vcmask 523264   ;;  %vm399_vm3 = vcmask 519168  }
   0x6   :  { %610 = vmatprep.subr.bf16.mxu0 %v66_v6  ;;  %40 = vadd.xlane.f32.xlu0 %v39_v12  ;;  %v45_v13 = vsel %vm38_vm0, %v36_v9, 0.0  ;;  %v42_v14 = vsel %vm38_vm0, %v35_v10, 0.0  ;;  %v48_v15 = vsel %vm38_vm0, %v37_v11, 0.0  ;;  %v670_v21 = vpack.c.bf16 %v169_v20, %v168_v19  ;;  %v283_v23 = vld [vmem:[%s959_s4 + $0x8] sm:$0xff]  ;;  %v284_v59 = vld [vmem:[%s959_s4 + $0x10] sm:$0xff]  ;;  %v285_v60 = vld [vmem:[%s959_s4 + $0x18] sm:$0xff] }
   0x7   :  { %46 = vadd.xlane.f32.xlu1 %v45_v13  ;;  %667 = vmatprep.subr.bf16.mxu1 %v666_v18  ;;  %v674_v24 = vpack.c.bf16 %v283_v23, %v282_v22  ;;  %v678_v61 = vpack.c.bf16 %v285_v60, %v284_v59  ;;  %v404_v62 = vld [vmem:[%s960_s5] sm:$0xff]  ;;  %v405_v63 = vld [vmem:[%s960_s5 + $0x8] sm:$0xff]  ;;  %v411_v8 = vld [vmem:[%s960_s5 + $0x38] sm:$0xff]  ;;  %s767_s24 = smov [#allocation4]  }
   0x8   :  { %669 = vmatpush3.bf16.msra.mxu1 %v666_v18  ;;  %v409_v5 = vld [vmem:[%s960_s5 + $0x28] sm:$0xff]  ;;  %v555_v10 = vld [vmem:[%s958_s3] ss:$0 sm:$0xff]  ;;  %s766_s3 = smov [#allocation2]   ;;  %s532_s25 = sshll.u32 %s767_s24, 4  ;;  %s912_s25 = int_to_ptr.vmem [resolvable:$true] %s532_s25 }
   0x9   :  { %611 = vmatpush3.bf16.msra.mxu0 %v66_v6  ;;  %671 = vmatprep.subr.bf16.mxu1 %v670_v21 }
   0xa   :  { %43 = vadd.xlane.f32.xlu0 %v42_v14  ;;  %675 = vmatprep.subr.bf16.mxu0 %v674_v24 }
   0xb   :  { %49 = vadd.xlane.f32.xlu1 %v48_v15 }
   0xc   :  { %613 = vmatmul.mubr.msk.bf16.vlgmr.msra.gmra.mrb[0].mxu0 %vm38_vm0, %v32_v7  ;;  %673 = vmatpush3.bf16.msra.mxu1 %v670_v21  ;;  %v410_v7 = vld [vmem:[%s960_s5 + $0x30] sm:$0xff] }
   0xd   :  { %677 = vmatpush3.bf16.msra.mxu0 %v674_v24  ;;  %v694_v9 = vpack.c.bf16 %v411_v8, %v410_v7 }
   0xe   :  { %679 = vmatprep.subr.bf16.mxu0 %v678_v61 }
  0x11   :  { %681 = vmatpush3.bf16.msra.mxu0 %v678_v61 }
  0x1c   :  { %151 = vrot.lane.b32.xlu1 %v62_v1, %s765_s0  ;;  %v682_v1 = vpack.c.bf16 %v405_v63, %v404_v62 }
  0x1e   :  { %683 = vmatprep.subr.bf16.mxu1 %v682_v1 }
  0x20   :  { %153 = vrot.lane.b32.xlu1 %v63_v2, %s765_s0  ;;  %149 = vrot.lane.b32.xlu0 %v61_v0, %s765_s0  ;;  %v406_v0 = vld [vmem:[%s960_s5 + $0x10] sm:$0xff]  ;;  %v407_v2 = vld [vmem:[%s960_s5 + $0x18] sm:$0xff] }
  0x21   :  { %v686_v3 = vpack.c.bf16 %v407_v2, %v406_v0 }
  0x24   :  { %155 = vrot.lane.b32.xlu1 %v64_v4, %s765_s0  ;;  %v408_v4 = vld [vmem:[%s960_s5 + $0x20] sm:$0xff]  ;;  %s520_s5 = sshll.u32 %s766_s3, 4  ;;  %s521_s5 = int_to_ptr.vmem [resolvable:$true] %s520_s5 }
  0x25   :  { %v690_v6 = vpack.c.bf16 %v409_v5, %v408_v4  ;;  %s717_s26 = scalar_lea.vmem %s521_s5, 512  ;;  %p722_p1 = scmp.lt.s32.totalorder %s521_s5, %s521_s5 }
  0x26   :  { %p718_p0 = scmp.ne.s32.totalorder %s521_s5, %s717_s26  ;;  %p723_p2 = scmp.lt.s32.totalorder %s717_s26, %s717_s26 }
  0x28   :  { %p724_p3 = por %p723_p2, %p722_p1 }
  0x2a   :  { %p725_p4 = pnand %p724_p3, %p718_p0 }
  0x93   :  { %v41_v26 = vpop.xlane.xlu0 %40 }
  0x94   :  { %v47_v25 = vpop.xlane.xlu1 %46 }
  0x97   :  { %v44_v28 = vpop.xlane.xlu0 %43 }
  0x98   :  { %v50_v27 = vpop.xlane.xlu1 %49  ;;  %v51_v30 = vpack.c.bf16 %v44_v28, %v41_v26 }
  0x99   :  { %v52_v29 = vpack.c.bf16 %v50_v27, %v47_v25 }
  0x9a   :  { %v53_v32 = vunpack.c.l.bf16 %v51_v30  ;;  %v54_v33 = vunpack.c.h.bf16 %v51_v30 }
  0x9b   :  { %v55_v31 = vunpack.c.l.bf16 %v52_v29  ;;  %v56_v34 = vunpack.c.h.bf16 %v52_v29  ;;  %v150_v42 = vpop.permute.xlu0 %149 }
  0x9c   :  { %v57_v36 = vmax.f32 %v53_v32, 1.0  ;;  %v58_v37 = vmax.f32 %v54_v33, 1.0  ;;  %v152_v39 = vpop.permute.xlu1 %151 }
  0x9d   :  { %v59_v35 = vmax.f32 %v55_v31, 1.0  ;;  %v60_v38 = vmax.f32 %v56_v34, 1.0 }
  0x9f   :  { %709 = vrcp.f32 %v59_v35 }
  0xa0   :  { %711 = vrcp.f32 %v57_v36  ;;  %v154_v44 = vpop.permute.xlu1 %153 }
  0xa1   :  { %713 = vrcp.f32 %v58_v37 }
  0xa2   :  { %715 = vrcp.f32 %v60_v38 }
  0xa4   :  { %v156_v56 = vpop.permute.xlu1 %155 }
  0xa9   :  { %v710_v40 = vpop.eup %709 }
  0xaa   :  { %v712_v43 = vpop.eup %711 }
  0xab   :  { %v714_v46 = vpop.eup %713 }
  0xac   :  { %v716_v49 = vpop.eup %715 }
  0xdf   :  { %v614_v41 = vpop.f32.mrb[0].mxu0 }
  0xe0   :  { %v117_v45 = vpop.f32.mrb[1].mxu0  ;;  %v138_v50 = vmul.f32 %v710_v40, %v614_v41 }
  0xe1   :  { %v136_v47 = vmul.f32 %v712_v43, %v117_v45  ;;  %v615_v48 = vpop.f32.mrb[2].mxu0 }
  0xe2   :  { %v120_v51 = vpop.f32.mrb[3].mxu0  ;;  %v139_v54 = vmul.f32 %v716_v49, %v615_v48  ;;  %v164_v57 = vsel %vm161_vm1, %v138_v50, %v154_v44 }
  0xe3   :  { %v137_v52 = vmul.f32 %v714_v46, %v120_v51  ;;  %v162_v53 = vsel %vm161_vm1, %v136_v47, %v150_v42 }
  0xe4   :  { %624 = vmatprep.mubr.msk.f32.mxu1 %vm38_vm0, %v162_v53  ;;  %v165_v58 = vsel %vm161_vm1, %v139_v54, %v156_v56 }
  0xe5   :  { %v163_v55 = vsel %vm161_vm1, %v137_v52, %v152_v39 }
  0xe6   :  { %625 = vmatmul.mubr.msk.f32.vlgmr.msra.gmra.mrb[0].mxu1 %vm38_vm0, %v163_v55 }
  0xe7   :  { %627 = vmatprep.mubr.msk.f32.mxu1 %vm38_vm0, %v164_v57  ;;  %685 = vmatpush3.bf16.msra.mxu1 %v682_v1 }
  0xe8   :  { %687 = vmatprep.subr.bf16.mxu1 %v686_v3 }
  0xea   :  { %628 = vmatmul.mubr.msk.f32.gmra.mrb[2].mxu1 %vm38_vm0, %v165_v58 }
  0xeb   :  { %689 = vmatpush3.bf16.msra.mxu1 %v686_v3 }
  0xec   :  { %691 = vmatprep.subr.bf16.mxu1 %v690_v6 }
  0xef   :  { %693 = vmatpush3.bf16.msra.mxu1 %v690_v6 }
  0xf0   :  { %695 = vmatprep.subr.bf16.mxu1 %v694_v9 }
  0xf3   :  { %697 = vmatpush3.bf16.msra.mxu1 %v694_v9 }
 0x1b9   :  { %v626_v11 = vpop.f32.mrb[0].mxu1 }
 0x1ba   :  { %v261_v12 = vadd.f32 %v626_v11, %v555_v10  ;;  %v255_v13 = vpop.f32.mrb[1].mxu1 }
 0x1bb   :  { %v256_v14 = vadd.f32 %v555_v10, %v255_v13 }
 0x1bc   :  { %v275_v15 = vmax.f32 %v261_v12, 0.0 }
 0x1bd   :  { %v274_v16 = vmax.f32 %v256_v14, 0.0  ;;  %v629_v17 = vpop.f32.mrb[2].mxu1 }
 0x1be   :  { %279 = vst.msk [vmem:[#allocation2 + $0x8] sm:$0xff] %vm38_vm0, %v275_v15  ;;  %v271_v18 = vadd.f32 %v629_v17, %v555_v10  ;;  %v265_v19 = vpop.f32.mrb[3].mxu1 }
 0x1bf   :  { %278 = vst.msk [vmem:[#allocation2] sm:$0xff] %vm38_vm0, %v274_v16  ;;  %v266_v20 = vadd.f32 %v555_v10, %v265_v19  ;;  %638 = vmatprep.mubr.msk.f32.mxu0 %vm38_vm0, %v274_v16 }
 0x1c0   :  { %v277_v21 = vmax.f32 %v271_v18, 0.0  ;;  %639 = vmatmul.mubr.msk.f32.vlgmr.msra.gmra.mrb[4].mxu0 %vm38_vm0, %v275_v15 }
 0x1c1   :  { %v276_v22 = vmax.f32 %v266_v20, 0.0 }
 0x1c2   :  { %281 = vst.msk [vmem:[#allocation2 + $0x18] sm:$0xff] %vm38_vm0, %v277_v21 }
 0x1c3   :  { %280 = vst.msk [vmem:[#allocation2 + $0x10] sm:$0xff] %vm38_vm0, %v276_v22  ;;  %641 = vmatprep.mubr.msk.f32.mxu0 %vm38_vm0, %v276_v22 }
 0x1c4   :  { %642 = vmatmul.mubr.msk.f32.gmra.mrb[6].mxu0 %vm38_vm0, %v277_v21 }
 0x293   :  { %v640_v23 = vpop.f32.mrb[4].mxu0 }
 0x294   :  { %v573_v24 = vpack.c.bf16 %v640_v23, %v640_v23  ;;  %v364_v25 = vpop.f32.mrb[5].mxu0 }
 0x295   :  { %v572_v26 = vpack.c.bf16 %v364_v25, %v364_v25  ;;  %660 = vmatprep.mubr.msk.f32.mxu1 %vm412_vm2, %v364_v25 }
 0x296   :  { %401 = vst.msk [vmem:[#allocation4 + $0x4] sm:$0xf] %vm399_vm3, %v573_v24  ;;  %661 = vmatmul.mubr.msk.f32.vlgmr.msra.gmra.mrb[4].mxu1 %vm412_vm2, %v640_v23 }
 0x297   :  { %400 = vst.msk [vmem:[#allocation4] sm:$0xf] %vm399_vm3, %v572_v26  ;;  %v643_v27 = vpop.f32.mrb[6].mxu0 }
 0x298   :  { %v575_v28 = vpack.c.bf16 %v643_v27, %v643_v27  ;;  %v374_v29 = vpop.f32.mrb[7].mxu0 }
 0x299   :  { %v574_v30 = vpack.c.bf16 %v374_v29, %v374_v29  ;;  %663 = vmatprep.mubr.msk.f32.mxu1 %vm412_vm2, %v374_v29 }
 0x29a   :  { %403 = vst.msk [vmem:[#allocation4 + $0xc] sm:$0xf] %vm399_vm3, %v575_v28  ;;  %664 = vmatmul.mubr.msk.f32.gmra.mrb[6].mxu1 %vm412_vm2, %v643_v27 }
 0x29b   :  { %402 = vst.msk [vmem:[#allocation4 + $0x8] sm:$0xf] %vm399_vm3, %v574_v30 }
 0x29c   :  { %728 = shalt.err (!%p725_p4)
}
 0x29d   :  { %s729_s28 = scalar_lea.hbm %s961_s6, 512 }
 0x29e   :  { %p730_p5 = scmp.ne.s32.totalorder %s961_s6, %s729_s28  ;;  %p733_p6 = scmp.lt.u32.totalorder %s729_s28, %s961_s6 }
 0x2a0   :  { %p735_p7 = pnand %p733_p6, %p730_p5 }
 0x2a2   :  { %738 = shalt.err (!%p735_p7)
}
 0x2a3   :  { %s768_s11 = smov 128   ;;  %s769_s12 = smov 8  }
 0x2a4   :  { %526 = dma.vmem_to_hbm [thread:$0]  %s521_s5, 512, %s961_s6, [#allocation3], %s768_s11, %s768_s11, %s769_s12  }
 0x2a5   :  { %s739_s15 = scalar_lea.vmem %s912_s25, 256  ;;  %p744_p9 = scmp.lt.s32.totalorder %s912_s25, %s912_s25 }
 0x2a6   :  { %p740_p8 = scmp.ne.s32.totalorder %s912_s25, %s739_s15  ;;  %p745_p10 = scmp.lt.s32.totalorder %s739_s15, %s739_s15 }
 0x2a8   :  { %p746_p11 = por %p745_p10, %p744_p9 }
 0x2aa   :  { %p747_p12 = pnand %p746_p11, %p740_p8 }
 0x2ac   :  { %750 = shalt.err (!%p747_p12)
}
 0x2ad   :  { %s751_s0 = scalar_lea.hbm %s962_s7, 256 }
 0x2ae   :  { %p752_p13 = scmp.ne.s32.totalorder %s962_s7, %s751_s0  ;;  %p755_p0 = scmp.lt.u32.totalorder %s751_s0, %s962_s7 }
 0x2b0   :  { %p757_p1 = pnand %p755_p0, %p752_p13 }
 0x2b2   :  { %760 = shalt.err (!%p757_p1)
}
 0x2b3   :  { %s770_s6 = smov 64   ;;  %s771_s20 = smov 4   ;;  %vm510_vm4 = vcmask 31744  }
 0x2b4   :  { %538 = dma.vmem_to_hbm [thread:$0]  %s912_s25, 256, %s962_s7, [#allocation5], %s770_s6, %s770_s6, %s771_s20  }
 0x369   :  { %v662_v31 = vpop.f32.mrb[4].mxu1 }
 0x36a   :  { %512 = vst.msk [vmem:[%s963_s8 + $0x8] sm:$0xff] %vm510_vm4, %v662_v31  ;;  %v491_v32 = vpop.f32.mrb[5].mxu1 }
 0x36b   :  { %511 = vst.msk [vmem:[%s963_s8] sm:$0xff] %vm510_vm4, %v491_v32 }
 0x36d   :  { %v665_v33 = vpop.f32.mrb[6].mxu1 }
 0x36e   :  { %514 = vst.msk [vmem:[%s963_s8 + $0x18] sm:$0xff] %vm510_vm4, %v665_v33  ;;  %v501_v34 = vpop.f32.mrb[7].mxu1 }
 0x36f   :  { %513 = vst.msk [vmem:[%s963_s8 + $0x10] sm:$0xff] %vm510_vm4, %v501_v34 }
 0x370   :  { %761 = dma.done.wait [#allocation3], 512  }
 0x371   :  { %762 = vsyncadd [#allocation3], 4294966784 }
 0x372   :  { %763 = dma.done.wait [#allocation5], 256  }
 0x373   :  { %764 = vsyncadd [#allocation5], 4294967040 }
 0x374   :  { %549 = vsyncpa [#allocation3], 1 }
 0x375   :  { %550 = vsyncpa [#allocation5], 1 }

</bundles_post_ra>
